<compile_context>
chip_gen: v5e
topology: v5e:2x2
jax: 0.10.0
libtpu: 0.0.40
codegen_flags: <defaults>
</compile_context>

<pallas_src>
import jax
import jax.numpy as jnp
from jax.experimental import pallas as pl
from jax.experimental.pallas import tpu as pltpu


def _round_up(x, m):
    return ((x + m - 1) // m) * m


def _cdiv(a, b):
    return -(-a // b)


def fm_kernel(x_ref, v_ref, s_ref, w_ref, b_ref, o_ref):
    # x_ref : (TB, F)   batch tile (streamed, double-buffered)
    # v_ref : (F, E)    embedding matrix (resident)
    # s_ref : (1, F)    0.5 * rowsum(V^2), lane-dense, f32 (resident)
    # w_ref : (1, F)    linear weight row, lane-dense, f32 (resident)
    # b_ref : (1,)      linear bias, SMEM scalar
    # o_ref : (1, 1, TB) lane-dense output slab
    x = x_ref[...]                                   # caller dtype (f32 or bf16)
    x32 = x.astype(jnp.float32)

    # --- 0.5 * out_1 : MXU matmul + MXU reduce over the embed dim ------------------
    xv = jnp.dot(x, v_ref[...], preferred_element_type=jnp.float32)        # (TB, E) f32
    half_col = jnp.full((xv.shape[1], 1), 0.5, dtype=jnp.float32)           # (E, 1)
    inter1 = jnp.dot(xv * xv, half_col,
                     preferred_element_type=jnp.float32)[:, 0]              # (TB,) = 0.5*out_1

    # --- fused  -0.5*out_2 + linear : single lane reduce over F ---------------------
    # -0.5 * (x^2 @ V^2).sum(1) + x @ w^T == sum_f x * (w - x * 0.5*rowsum(V^2))
    s_half = s_ref[...]                                                     # (1, F) f32
    w = w_ref[...]                                                          # (1, F) f32
    fused = jnp.sum(x32 * (w - x32 * s_half), axis=1)                       # (TB,)

    out = inter1 + fused + b_ref[0]                                         # (TB,)
    # Padded / garbage tail rows evaluate to arbitrary (finite or not) values here;
    # they are sliced off in the wrapper — do NOT add any cross-row reduction.
    o_ref[...] = out.reshape(o_ref.shape).astype(o_ref.dtype)


def _vmem_limit_bytes():
    """Generation-aware scoped-VMEM budget (leave headroom below physical)."""
    try:
        cap = int(pltpu.get_tpu_info().vmem_capacity_bytes)
    except Exception:
        cap = 64 << 20          # conservative fallback (v7x physical per-TC VMEM)
    return max(32 << 20, min(cap - (8 << 20), 100 << 20))


def _auto_tile_rows(x_itemsize, vmem_limit):
    """Byte-budgeted batch tile.  Lane dim pads F (and E) up to 128, so the real
    per-row VMEM cost is 128 lanes wide regardless of F: 2 double-buffered x tiles
    plus ~5 f32-sized temporaries (x32, xv, xv^2, fused product, output staging)."""
    bytes_per_row = 2 * 128 * x_itemsize + 5 * 128 * 4
    tb = int(0.5 * vmem_limit) // bytes_per_row
    return max(8, min(32768, (tb // 8) * 8))


def fm_forward(x, V, W, b, *, tb=None, stream_dtype=None):
    """x: (B, F); V: (F, E); W: (1, F) torch-style nn.Linear weight; b: (1,).

    tb:           optional manual batch-tile override (rows).
    stream_dtype: e.g. jnp.bfloat16 to halve HBM traffic for x / V; the squaring /
                  subtraction path stays in f32 inside the kernel.
    """
    B, F = x.shape
    Fv, E = V.shape
    assert Fv == F, (Fv, F)

    if stream_dtype is not None:
        x = x.astype(stream_dtype)
        V = V.astype(stream_dtype)

    # Tiny precomputes in the wrapper (O(F*E)): 0.5*rowsum(V^2) and the weight row, f32.
    s_half = (0.5 * jnp.sum(V.astype(jnp.float32) ** 2, axis=1)).reshape(1, F)
    w_row = W.reshape(1, F).astype(jnp.float32)
    b1d = b.reshape(1).astype(jnp.float32)

    vmem_limit = _vmem_limit_bytes()
    tb_cap = _auto_tile_rows(jnp.dtype(x.dtype).itemsize, vmem_limit)
    if tb is not None:
        tb_cap = max(8, (int(tb) // 8) * 8)

    rows = _round_up(B, 8)
    if rows <= tb_cap:
        # Fits in one pass; if large enough, split into >=2 tiles so both v7x
        # TensorCores (dimension_semantics="parallel") get work.
        TB = _round_up(_cdiv(rows, 2), 8) if rows >= 2048 else rows
    else:
        TB = tb_cap
    num_tiles = _cdiv(B, TB)
    # NOTE: no wrapper-side jnp.pad (that would be an extra full HBM pass of x).
    # The ragged tail block reads stale rows whose outputs are sliced off below.

    out3d = pl.pallas_call(
        fm_kernel,
        out_shape=jax.ShapeDtypeStruct((num_tiles, 1, TB), jnp.float32),
        grid_spec=pl.GridSpec(
            grid=(num_tiles,),
            in_specs=[
                pl.BlockSpec((TB, F), lambda i: (i, 0)),       # x: streamed over batch
                pl.BlockSpec((F, E), lambda i: (0, 0)),        # V: resident
                pl.BlockSpec((1, F), lambda i: (0, 0)),        # 0.5*rowsum(V^2): resident
                pl.BlockSpec((1, F), lambda i: (0, 0)),        # linear weight row: resident
                pl.BlockSpec(memory_space=pltpu.MemorySpace.SMEM),  # bias scalar
            ],
            out_specs=pl.BlockSpec((1, 1, TB), lambda i: (i, 0, 0)),
        ),
        compiler_params=pltpu.CompilerParams(
            dimension_semantics=("parallel",),
            vmem_limit_bytes=int(vmem_limit),
        ),
    )(x, V, s_half, w_row, b1d)

    return out3d.reshape(num_tiles * TB)[:B]                               # (B,)


def fm_reference(x, V, W, b):
    out_1 = jnp.sum(jnp.square(x @ V), axis=1, keepdims=True)
    out_2 = jnp.sum(jnp.square(x) @ jnp.square(V), axis=1, keepdims=True)
    out_inter = 0.5 * (out_1 - out_2)
    out_lin = x @ W.T + b
    return (out_inter + out_lin).squeeze(1)


if __name__ == "__main__":
    key = jax.random.PRNGKey(0)
    k_x, k_v, k_w, k_b = jax.random.split(key, 4)

    batch, field_dims, embed_dim = 8, 16, 32

    x = jax.random.normal(k_x, (batch, field_dims), dtype=jnp.float32)
    V = jax.random.normal(k_v, (field_dims, embed_dim), dtype=jnp.float32)
    # nn.Linear(field_dims, 1): weight (1, field_dims), bias (1,)
    W = jax.random.normal(k_w, (1, field_dims), dtype=jnp.float32) * 0.1
    b = jax.random.normal(k_b, (1,), dtype=jnp.float32) * 0.1

    # 1) small batch, single tile
    out = jax.block_until_ready(fm_forward(x, V, W, b))
    ref = fm_reference(x, V, W, b)
    assert out.shape == (batch,), out.shape
    assert jnp.allclose(out, ref, atol=1e-3, rtol=1e-3), (out, ref)

    # 2) multi-tile + ragged tail block (B % TB != 0), no wrapper-side pad
    batch2 = 300
    x2 = jax.random.normal(k_x, (batch2, field_dims), dtype=jnp.float32)
    out2 = jax.block_until_ready(fm_forward(x2, V, W, b, tb=128))
    ref2 = fm_reference(x2, V, W, b)
    assert out2.shape == (batch2,), out2.shape
    assert jnp.allclose(out2, ref2, atol=1e-3, rtol=1e-3)

    # 3) auto (byte-budgeted) tiling path; large enough to split across >=2 tiles
    batch3 = 4096
    x3 = jax.random.normal(k_x, (batch3, field_dims), dtype=jnp.float32)
    out3 = jax.block_until_ready(fm_forward(x3, V, W, b))
    ref3 = fm_reference(x3, V, W, b)
    assert out3.shape == (batch3,), out3.shape
    assert jnp.allclose(out3, ref3, atol=1e-3, rtol=1e-3)

    # 4) bf16 streaming path (half the HBM bytes for x / V); compare against the
    #    reference evaluated on the same bf16-rounded values so the check isolates
    #    kernel error rather than the cast itself.
    x3_b = x3.astype(jnp.bfloat16).astype(jnp.float32)
    V_b = V.astype(jnp.bfloat16).astype(jnp.float32)
    out4 = jax.block_until_ready(fm_forward(x3, V, W, b, stream_dtype=jnp.bfloat16))
    ref4 = fm_reference(x3_b, V_b, W, b)
    assert out4.shape == (batch3,), out4.shape
    assert jnp.allclose(out4, ref4, atol=3e-2, rtol=3e-2)

    print("KERNEL_OK")
</pallas_src>

<mosaic_0001>
module attributes {stable_mosaic.version = 11 : i64} {
  func.func @fm_kernel(%arg0: i32, %arg1: memref<8x16xf32, #tpu.memory_space<vmem>>, %arg2: memref<16x32xf32, #tpu.memory_space<vmem>>, %arg3: memref<1x16xf32, #tpu.memory_space<vmem>>, %arg4: memref<1x16xf32, #tpu.memory_space<vmem>>, %arg5: memref<1xf32, #tpu.memory_space<smem>>, %arg6: memref<1x1x8xf32, #tpu.memory_space<vmem>>) attributes {dimension_semantics = [#tpu.dimension_semantics<parallel>], iteration_bounds = array<i64: 1>, scalar_prefetch = 0 : i64, scratch_operands = 0 : i64, tpu.core_type = #tpu.core_type<tc>, window_params = [{transform_indices = @transform_0, window_bounds = array<i64: 8, 16>}, {pipeline_mode = #tpu.pipeline_mode<synchronous>, transform_indices = @transform_1, window_bounds = array<i64: 16, 32>}, {pipeline_mode = #tpu.pipeline_mode<synchronous>, transform_indices = @transform_2, window_bounds = array<i64: 1, 16>}, {pipeline_mode = #tpu.pipeline_mode<synchronous>, transform_indices = @transform_3, window_bounds = array<i64: 1, 16>}, {transform_indices = @transform_4, window_bounds = array<i64: 1>}, {transform_indices = @transform_5, window_bounds = array<i64: 1, 1, 8>}]} {
    %c0 = arith.constant 0 : index
    %c0_0 = arith.constant 0 : index
    %0 = vector.load %arg1[%c0, %c0_0] : memref<8x16xf32, #tpu.memory_space<vmem>>, vector<8x16xf32>
    %c0_1 = arith.constant 0 : index
    %c0_2 = arith.constant 0 : index
    %1 = vector.load %arg2[%c0_1, %c0_2] : memref<16x32xf32, #tpu.memory_space<vmem>>, vector<16x32xf32>
    %cst = arith.constant dense<0.000000e+00> : vector<8x32xf32>
    %2 = tpu.matmul %0, %1, %cst {dimension_numbers = #tpu.dot_dimension_numbers<[1], [0], [0], [1], [0, 0, 1, 1], [], []>} : vector<8x16xf32>, vector<16x32xf32>, vector<8x32xf32> -> vector<8x32xf32>
    %cst_3 = arith.constant 5.000000e-01 : f32
    %3 = vector.broadcast %cst_3 : f32 to vector<32x1xf32>
    %4 = arith.mulf %2, %2 : vector<8x32xf32>
    %cst_4 = arith.constant dense<0.000000e+00> : vector<8x1xf32>
    %5 = tpu.matmul %4, %3, %cst_4 {dimension_numbers = #tpu.dot_dimension_numbers<[1], [0], [0], [1], [0, 0, 1, 1], [], []>} : vector<8x32xf32>, vector<32x1xf32>, vector<8x1xf32> -> vector<8x1xf32>
    %6 = vector.shape_cast %5 : vector<8x1xf32> to vector<8xf32>
    %c0_5 = arith.constant 0 : index
    %c0_6 = arith.constant 0 : index
    %7 = vector.load %arg3[%c0_5, %c0_6] : memref<1x16xf32, #tpu.memory_space<vmem>>, vector<1x16xf32>
    %c0_7 = arith.constant 0 : index
    %c0_8 = arith.constant 0 : index
    %8 = vector.load %arg4[%c0_7, %c0_8] : memref<1x16xf32, #tpu.memory_space<vmem>>, vector<1x16xf32>
    %9 = vector.broadcast %7 : vector<1x16xf32> to vector<8x16xf32>
    %10 = arith.mulf %0, %9 : vector<8x16xf32>
    %11 = vector.broadcast %8 : vector<1x16xf32> to vector<8x16xf32>
    %12 = arith.subf %11, %10 : vector<8x16xf32>
    %13 = arith.mulf %0, %12 : vector<8x16xf32>
    %cst_9 = arith.constant dense<0.000000e+00> : vector<8xf32>
    %14 = vector.multi_reduction <add>, %13, %cst_9 [1] : vector<8x16xf32> to vector<8xf32>
    %15 = arith.addf %6, %14 : vector<8xf32>
    %c0_10 = arith.constant 0 : index
    %16 = memref.load %arg5[%c0_10] : memref<1xf32, #tpu.memory_space<smem>>
    %17 = vector.broadcast %16 : f32 to vector<8xf32>
    %18 = arith.addf %15, %17 : vector<8xf32>
    %19 = vector.shape_cast %18 : vector<8xf32> to vector<1x1x8xf32>
    %c0_11 = arith.constant 0 : index
    %c0_12 = arith.constant 0 : index
    %c0_13 = arith.constant 0 : index
    %20 = vector.load %arg6[%c0_11, %c0_12, %c0_13] : memref<1x1x8xf32, #tpu.memory_space<vmem>>, vector<1x1x8xf32>
    tpu.vector_store %arg6[%c0_11, %c0_12, %c0_13], %19 {strides = array<i32>} : memref<1x1x8xf32, #tpu.memory_space<vmem>>, vector<1x1x8xf32>,
    return
  }
  func.func @transform_0(%arg0: i32) -> (i32, i32) {
    %c0_i32 = arith.constant 0 : i32
    %c0_i32_0 = arith.constant 0 : i32
    return %arg0, %c0_i32 : i32, i32
  }
  func.func @transform_1(%arg0: i32) -> (i32, i32) {
    %c0_i32 = arith.constant 0 : i32
    %c0_i32_0 = arith.constant 0 : i32
    %c0_i32_1 = arith.constant 0 : i32
    return %c0_i32, %c0_i32_0 : i32, i32
  }
  func.func @transform_2(%arg0: i32) -> (i32, i32) {
    %c0_i32 = arith.constant 0 : i32
    %c0_i32_0 = arith.constant 0 : i32
    %c0_i32_1 = arith.constant 0 : i32
    return %c0_i32, %c0_i32_0 : i32, i32
  }
  func.func @transform_3(%arg0: i32) -> (i32, i32) {
    %c0_i32 = arith.constant 0 : i32
    %c0_i32_0 = arith.constant 0 : i32
    %c0_i32_1 = arith.constant 0 : i32
    return %c0_i32, %c0_i32_0 : i32, i32
  }
  func.func @transform_4(%arg0: i32) -> i32 {
    %c0_i32 = arith.constant 0 : i32
    %c0_i32_0 = arith.constant 0 : i32
    return %c0_i32 : i32
  }
  func.func @transform_5(%arg0: i32) -> (i32, i32, i32) {
    %c0_i32 = arith.constant 0 : i32
    %c0_i32_0 = arith.constant 0 : i32
    %c0_i32_1 = arith.constant 0 : i32
    return %arg0, %c0_i32, %c0_i32_0 : i32, i32, i32
  }
}

</mosaic_0001>

<bundles_post_ra>
// kernel: tpu_custom_call.1
= control target key start
LH: loop header
LB: loop body
LE: loop exit
PB: predicated region body
PF: predicated region fallthrough
CT: control target
= control target key end

     0   :  { %11 = vsyncpa [#allocation4], 0  ;;  %s295_s0 = inlined_call_operand.hbm [shape: f32[8,16], index: 0, kind: input, shape index: {}]   ;;  %s296_s1 = inlined_call_operand.hbm [shape: f32[16,32], index: 1, kind: input, shape index: {}]   ;;  %s297_s2 = inlined_call_operand.vmem [shape: f32[1,16], index: 2, kind: input, shape index: {}]   ;;  %s298_s3 = inlined_call_operand.vmem [shape: f32[1,16], index: 3, kind: input, shape index: {}]   ;;  %s299_s4 = inlined_call_operand.<no memory space> [shape: f32[1], index: 4, kind: input, shape index: {}]   ;;  %s300_s5 = inlined_call_operand.hbm [shape: f32[1,1,8], index: 5, kind: output, shape index: {}]  }
   0x1   :  { %12 = vsyncpa [#allocation7], 0 }
   0x2   :  { %13 = vsyncpa [#allocation5], 0  ;;  %s19_s20 = sshll.u32 %s295_s0, 4  ;;  %s240_s21 = smov [#allocation3]   ;;  %s20_s20 = int_to_ptr.hbm [resolvable:$true] %s19_s20 }
   0x3   :  { %s21_s22 = sshll.u32 %s240_s21, 4  ;;  %s29_s25 = sshll.u32 %s296_s1, 4  ;;  %s22_s22 = int_to_ptr.vmem [resolvable:$true] %s21_s22  ;;  %s30_s25 = int_to_ptr.hbm [resolvable:$true] %s29_s25 }
   0x4   :  { %24 = dma.hbm_to_vmem [thread:$0]  %s20_s20, 128, %s22_s22, [#allocation4]  }
   0x5   :  { %s241_s26 = smov [#allocation6]   ;;  %s242_s28 = smov 128  }
   0x6   :  { %s31_s27 = sshll.u32 %s241_s26, 4  ;;  %s243_s29 = smov 8   ;;  %s32_s27 = int_to_ptr.vmem [resolvable:$true] %s31_s27 }
   0x7   :  { %37 = dma.hbm_to_vmem [thread:$0]  %s30_s25, 256, %s32_s27, [#allocation7], %s242_s28, %s242_s28, %s243_s29  }
   0x8   :  { %234 = dma.done.wait [#allocation4], 128  }
   0x9   :  { %235 = vsyncadd [#allocation4], 4294967168 }
   0xa   :  { %236 = dma.done.wait [#allocation7], 256  }
   0xb   :  { %237 = vsyncadd [#allocation7], 4294967040  ;;  %v244_v0 = vmov 0.5   ;;  %v54_v1 = vld [vmem:[#allocation6 + $0x8] sm:$0xff]  ;;  %v53_v2 = vld [vmem:[#allocation6] sm:$0xff]  ;;  %vm55_vm0 = vcmask 130048   ;;  %v120_v15 = vstv %s299_s4  ;;  %v126_v18 = vlaneseq }
   0xc   :  { %96 = vmatpush.msra.mxu1 %v244_v0  ;;  %73 = vmatpush.msra.mxu0 %v54_v1  ;;  %v52_v3 = vld [vmem:[#allocation3] sm:$0xff]  ;;  %vm80_vm1 = vcmask 261120   ;;  %v245_v12 = vmov 0   ;;  %s139_s11 = sshll.u32 %s300_s5, 4  ;;  %vm130_vm2 = vcmask 57344   ;;  %s140_s11 = int_to_ptr.hbm [resolvable:$true] %s139_s11 }
   0xd   :  { %v160_v4 = vld [vmem:[%s297_s2] ss:$0 sm:$0xff]  ;;  %159 = vset.pattern.permute.xlu0 %v245_v12  ;;  %v127_v19 = vand.u32 127, %v126_v18  ;;  %s246_s2 = smov [#allocation8]  }
   0xe   :  { %97 = vmatpush.msra.mxu1 %v244_v0  ;;  %74 = vmatpush.msra.mxu0 %v53_v2  ;;  %v109_v5 = vmul.f32 %v160_v4, %v52_v3  ;;  %v161_v6 = vld [vmem:[%s298_s3] ss:$0 sm:$0xff]  ;;  %s137_s3 = sshll.u32 %s246_s2, 4  ;;  %s138_s3 = int_to_ptr.vmem [resolvable:$true] %s137_s3 }
   0xf   :  { %150 = vmatmul.msk.f32.vlgmr.msra.gmra.mxu0 %vm55_vm0, %v52_v3 }
  0x10   :  { %98 = vmatpush.msra.mxu1 %v244_v0  ;;  %v113_v7 = vsub.f32 %v161_v6, %v109_v5 }
  0x12   :  { %99 = vmatpush.msra.mxu1 %v244_v0  ;;  %v114_v8 = vmul.f32 %v113_v7, %v52_v3 }
  0x14   :  { %v115_v9 = vsel %vm55_vm0, %v114_v8, 0.0 }
  0x15   :  { %116 = vadd.xlane.f32.xlu0 %v115_v9 }
  0x88   :  { %v117_v13 = vpop.xlane.xlu0 %116 }
  0x8c   :  { %v76_v10 = vpop.f32.mrf.mxu0 }
  0x8d   :  { %v79_v11 = vmul.f32 %v76_v10, %v76_v10 }
  0x8f   :  { %151 = vmatmul.msk.f32.vlgmr.msra.gmra.mxu1 %vm80_vm1, %v79_v11 }
 0x10c   :  { %v101_v14 = vpop.f32.mrf.mxu1 }
 0x10d   :  { %v118_v16 = vadd.f32 %v117_v13, %v101_v14 }
 0x10f   :  { %v121_v17 = vadd.f32 %v120_v15, %v118_v16 }
 0x111   :  { %124 = vperm.xlu0 %159, %v121_v17  }
 0x183   :  { %v125_v20 = vpop.permute.xlu0 %124 }
 0x184   :  { %v128_v21 = vperm.slane %v125_v20, %v127_v19 }
 0x186   :  { %131 = vst.msk [vmem:[#allocation8] sm:$0x1] %vm130_vm2, %v128_v21 }
 0x187   :  { %142 = dma.vmem_to_hbm [thread:$0]  %s138_s3, 16, %s140_s11, [#allocation5]  }
 0x188   :  { %238 = dma.done.wait [#allocation5], 16  }
 0x189   :  { %239 = vsyncadd [#allocation5], 4294967280 }
 0x18a   :  { %147 = vsyncpa [#allocation4], 1 }
 0x18b   :  { %148 = vsyncpa [#allocation7], 1 }
 0x18c   :  { %149 = vsyncpa [#allocation5], 1 }

</bundles_post_ra>
